<compile_context>
chip_gen: v7x
topology: tpu7x:2x2x1
jax: 0.10.0
libtpu: 0.0.40
codegen_flags: <defaults>
</compile_context>

<pallas_src>
import functools

import jax
import jax.numpy as jnp
from jax import lax
from jax.experimental import pallas as pl
from jax.experimental.pallas import tpu as pltpu


def _patch_block_kernel(
    xst_ref,    # (nb, c_in, hw)         raw x, compact view for StyleIN statistics
    xcol_ref,   # (c_in*16, nb*npos)     im2col of raw (zero-padded) x
    sig_ref,    # (nb, c_in, 1)          sigma[y]
    mu_ref,     # (nb, c_in, 1)          mu[y]
    w2_ref,     # (c_out, c_in*16)       conv weight, OIHW flattened
    bconv_ref,  # (c_out, 1)
    wskip_ref,  # (c_out, c_in)          1x1 skip conv weight
    bskip_ref,  # (c_out, 1)
    rez_ref,    # (1,) in SMEM           rezero scalar
    o_ref,      # (c_out, nb*npos)       lane-dense output slab
    *, nb, c_in, c_out, npos, hw,
):
    ncols = nb * npos
    ntap = 16

    # ---- StyleIN stats per (n, c) over the true H*W spatial extent ----
    xs = xst_ref[...]                                        # (nb, c_in, hw)
    mean = jnp.mean(xs, axis=2, keepdims=True)               # (nb, c_in, 1)
    d = xs - mean
    var = jnp.sum(d * d, axis=2, keepdims=True) / float(hw - 1)   # unbiased (torch.var_mean)
    inv = lax.rsqrt(var + 1e-6)
    scale = inv * sig_ref[...]                               # (nb, c_in, 1)
    shift = mu_ref[...] - mean * scale                       # (nb, c_in, 1)

    # Broadcast the per-(n, c) constants onto the im2col layout:
    #   row r -> channel r // 16 ; col l -> batch l // npos
    def bcast(v):                                            # (nb, c_in, 1) -> (c_in*16, ncols)
        cols = []
        for n in range(nb):                                  # static, tiny
            vn = v[n]                                        # (c_in, 1)
            vn = jnp.broadcast_to(vn[:, None, :], (c_in, ntap, 1)).reshape(c_in * ntap, 1)
            cols.append(jnp.broadcast_to(vn, (c_in * ntap, npos)))
        return cols[0] if nb == 1 else jnp.concatenate(cols, axis=1)

    scale_bc = bcast(scale)
    shift_bc = bcast(shift)

    # ---- StyleIN affine + ReLU on the im2col matrix, then ONE fused conv matmul ----
    xcol = xcol_ref[...]                                     # (c_in*16, ncols)
    a = jnp.maximum(xcol * scale_bc + shift_bc, 0.0)
    conv = jnp.dot(w2_ref[...], a, preferred_element_type=jnp.float32)     # (c_out, ncols)
    conv = conv + bconv_ref[...]

    # ---- MaxPool(4, stride 2) on raw x == max over the 16 taps, then 1x1 skip conv ----
    pooled = jnp.max(xcol.reshape(c_in, ntap, ncols), axis=1)              # (c_in, ncols)
    skip = jnp.dot(wskip_ref[...], pooled, preferred_element_type=jnp.float32) + bskip_ref[...]

    o_ref[...] = conv * rez_ref[0] + skip


def _pick_batch_block(n, npos):
    """Batches per grid step; prefer a lane-dense (multiple of 128) column count."""
    for nb in range(min(n, max(1, 256 // npos)), 0, -1):
        if n % nb == 0 and (nb * npos) % 128 == 0:
            return nb
    return n   # single step; every block equals the full array (always legal)


def patch_block_forward(x_nchw, y, params, *, strides=2):
    assert strides == 2, "kernel assumes stride 2 (kernel_size = 2*strides = 4)"
    n, c_in, h, w = x_nchw.shape
    assert h % 2 == 0 and w % 2 == 0
    k = 2 * strides
    oh = (h - k) // strides + 1
    ow = (w - k) // strides + 1
    s = h // 2                                   # padded output grid is s x s (>= oh x ow)
    npos = s * s
    ntap = k * k
    c_out = params["wconv"].shape[0]
    hw = h * w

    nb = _pick_batch_block(n, npos)
    grid = (n // nb,)

    # ---- wrapper-side layout prep (pure XLA, cheap at these sizes) ----
    # im2col of the raw input, zero-padded on bottom/right so the s x s grid is complete;
    # padded positions are cropped after the kernel.
    x_pad = jnp.pad(x_nchw, ((0, 0), (0, 0), (0, k - strides), (0, k - strides)))
    taps = [x_pad[:, :, kh:kh + h:strides, kw:kw + w:strides]     # (N, C, s, s) each
            for kh in range(k) for kw in range(k)]
    xcol = jnp.stack(taps, axis=0)                                # (16, N, C, s, s)
    xcol = jnp.transpose(xcol, (2, 0, 1, 3, 4))                   # (C, 16, N, s, s)
    xcol = xcol.reshape(c_in * ntap, n * npos)

    xst = x_nchw.reshape(n, c_in, hw)
    sig_y = params["sigma"][y].reshape(n, c_in, 1)
    mu_y = params["mu"][y].reshape(n, c_in, 1)
    w2 = params["wconv"].reshape(c_out, c_in * ntap)              # OIHW flatten == im2col row order
    wskip2 = params["wskip"].reshape(c_out, c_in)
    bconv = params["bconv"].reshape(c_out, 1)
    bskip = params["bskip"].reshape(c_out, 1)
    rez = params["rezero"].reshape(1)

    kernel = functools.partial(
        _patch_block_kernel, nb=nb, c_in=c_in, c_out=c_out, npos=npos, hw=hw)

    out_t = pl.pallas_call(
        kernel,
        out_shape=jax.ShapeDtypeStruct((c_out, n * npos), jnp.float32),
        grid=grid,
        in_specs=[
            pl.BlockSpec((nb, c_in, hw), lambda g: (g, 0, 0)),
            pl.BlockSpec((c_in * ntap, nb * npos), lambda g: (0, g)),
            pl.BlockSpec((nb, c_in, 1), lambda g: (g, 0, 0)),
            pl.BlockSpec((nb, c_in, 1), lambda g: (g, 0, 0)),
            pl.BlockSpec((c_out, c_in * ntap), lambda g: (0, 0)),
            pl.BlockSpec((c_out, 1), lambda g: (0, 0)),
            pl.BlockSpec((c_out, c_in), lambda g: (0, 0)),
            pl.BlockSpec((c_out, 1), lambda g: (0, 0)),
            pl.BlockSpec(memory_space=pltpu.MemorySpace.SMEM),
        ],
        out_specs=pl.BlockSpec((c_out, nb * npos), lambda g: (0, g)),
        compiler_params=pltpu.CompilerParams(dimension_semantics=("parallel",)),
    )(xst, xcol, sig_y, mu_y, w2, bconv, wskip2, bskip, rez)

    # (c_out, N*s*s) -> NCHW, cropping the zero-padded output positions (tiny array).
    out = out_t.reshape(c_out, n, s, s)
    return jnp.transpose(out, (1, 0, 2, 3))[:, :, :oh, :ow]


def patch_block_reference(x, y, params):
    """Pure-JAX reference mirroring the PyTorch forward (NCHW)."""
    mean = jnp.mean(x, axis=(2, 3), keepdims=True)
    var = jnp.var(x, axis=(2, 3), ddof=1, keepdims=True)
    nrm = (x - mean) * lax.rsqrt(var + 1e-6)
    styled = nrm * params["sigma"][y][:, :, None, None] + params["mu"][y][:, :, None, None]
    a = jnp.maximum(styled, 0.0)
    res = lax.conv_general_dilated(
        a, params["wconv"], window_strides=(2, 2), padding="VALID",
        dimension_numbers=("NCHW", "OIHW", "NCHW"),
        precision=lax.Precision.HIGHEST) + params["bconv"][None, :, None, None]
    pooled = lax.reduce_window(x, -jnp.inf, lax.max, (1, 1, 4, 4), (1, 1, 2, 2), "VALID")
    skipv = lax.conv_general_dilated(
        pooled, params["wskip"], window_strides=(1, 1), padding="VALID",
        dimension_numbers=("NCHW", "OIHW", "NCHW"),
        precision=lax.Precision.HIGHEST) + params["bskip"][None, :, None, None]
    return res * params["rezero"] + skipv


if __name__ == "__main__":
    key = jax.random.PRNGKey(0)
    ks = jax.random.split(key, 8)

    N, C_IN, C_OUT, H, W = 2, 4, 8, 16, 16
    MAX_STYLES, STRIDES = 5, 2
    K = 2 * STRIDES

    # Deterministic parameter init (shapes from PatchBlock.__init__).
    # NOTE: PyTorch inits sigma/mu/rezero to zeros; nonzero deterministic values are used
    # here so the norm/conv/rezero path is actually exercised.
    params = {
        "wconv": 0.15 * jax.random.normal(ks[0], (C_OUT, C_IN, K, K), jnp.float32),
        "bconv": 0.10 * jax.random.normal(ks[1], (C_OUT,), jnp.float32),
        "wskip": 0.30 * jax.random.normal(ks[2], (C_OUT, C_IN, 1, 1), jnp.float32),
        "bskip": 0.10 * jax.random.normal(ks[3], (C_OUT,), jnp.float32),
        "sigma": 0.5 + 0.3 * jax.random.normal(ks[4], (MAX_STYLES, C_IN), jnp.float32),
        "mu": 0.2 * jax.random.normal(ks[5], (MAX_STYLES, C_IN), jnp.float32),
        "rezero": jnp.array([0.7], jnp.float32),
    }

    x = jax.random.normal(ks[6], (N, C_IN, H, W), jnp.float32)
    y = jax.random.randint(ks[7], (N,), 0, MAX_STYLES, dtype=jnp.int32)

    out = patch_block_forward(x, y, params, strides=STRIDES)
    out = jax.block_until_ready(out)

    ref = patch_block_reference(x, y, params)
    assert out.shape == ref.shape == (N, C_OUT, 7, 7), (out.shape, ref.shape)
    max_err = float(jnp.max(jnp.abs(out - ref)))
    if not bool(jnp.allclose(out, ref, atol=1e-2, rtol=1e-2)):
        raise AssertionError(f"kernel/reference mismatch, max abs err = {max_err}")
    print("KERNEL_OK")
</pallas_src>

<mosaic_0001>
module attributes {stable_mosaic.version = 11 : i64} {
  func.func @_patch_block_kernel(%arg0: i32, %arg1: memref<2x4x256xf32, #tpu.memory_space<vmem>>, %arg2: memref<64x128xf32, #tpu.memory_space<vmem>>, %arg3: memref<2x4x1xf32, #tpu.memory_space<vmem>>, %arg4: memref<2x4x1xf32, #tpu.memory_space<vmem>>, %arg5: memref<8x64xf32, #tpu.memory_space<vmem>>, %arg6: memref<8x1xf32, #tpu.memory_space<vmem>>, %arg7: memref<8x4xf32, #tpu.memory_space<vmem>>, %arg8: memref<8x1xf32, #tpu.memory_space<vmem>>, %arg9: memref<1xf32, #tpu.memory_space<smem>>, %arg10: memref<8x128xf32, #tpu.memory_space<vmem>>) attributes {dimension_semantics = [#tpu.dimension_semantics<parallel>], iteration_bounds = array<i64: 1>, scalar_prefetch = 0 : i64, scratch_operands = 0 : i64, tpu.core_type = #tpu.core_type<tc>, window_params = [{transform_indices = @transform_0, window_bounds = array<i64: 2, 4, 256>}, {transform_indices = @transform_1, window_bounds = array<i64: 64, 128>}, {transform_indices = @transform_2, window_bounds = array<i64: 2, 4, 1>}, {transform_indices = @transform_3, window_bounds = array<i64: 2, 4, 1>}, {pipeline_mode = #tpu.pipeline_mode<synchronous>, transform_indices = @transform_4, window_bounds = array<i64: 8, 64>}, {pipeline_mode = #tpu.pipeline_mode<synchronous>, transform_indices = @transform_5, window_bounds = array<i64: 8, 1>}, {pipeline_mode = #tpu.pipeline_mode<synchronous>, transform_indices = @transform_6, window_bounds = array<i64: 8, 4>}, {pipeline_mode = #tpu.pipeline_mode<synchronous>, transform_indices = @transform_7, window_bounds = array<i64: 8, 1>}, {transform_indices = @transform_8, window_bounds = array<i64: 1>}, {transform_indices = @transform_9, window_bounds = array<i64: 8, 128>}]} {
    %c0 = arith.constant 0 : index
    %c0_0 = arith.constant 0 : index
    %c0_1 = arith.constant 0 : index
    %0 = vector.load %arg1[%c0, %c0_0, %c0_1] : memref<2x4x256xf32, #tpu.memory_space<vmem>>, vector<2x4x256xf32>
    %cst = arith.constant dense<0.000000e+00> : vector<2x4xf32>
    %1 = vector.multi_reduction <add>, %0, %cst [2] : vector<2x4x256xf32> to vector<2x4xf32>
    %2 = vector.shape_cast %1 : vector<2x4xf32> to vector<2x4x1xf32>
    %cst_2 = arith.constant 2.560000e+02 : f32
    %3 = vector.broadcast %cst_2 : f32 to vector<2x4x1xf32>
    %4 = arith.divf %2, %3 : vector<2x4x1xf32>
    %5 = vector.broadcast %4 : vector<2x4x1xf32> to vector<2x4x256xf32>
    %6 = arith.subf %0, %5 : vector<2x4x256xf32>
    %7 = arith.mulf %6, %6 : vector<2x4x256xf32>
    %cst_3 = arith.constant dense<0.000000e+00> : vector<2x4xf32>
    %8 = vector.multi_reduction <add>, %7, %cst_3 [2] : vector<2x4x256xf32> to vector<2x4xf32>
    %9 = vector.shape_cast %8 : vector<2x4xf32> to vector<2x4x1xf32>
    %cst_4 = arith.constant 2.550000e+02 : f32
    %10 = vector.broadcast %cst_4 : f32 to vector<2x4x1xf32>
    %11 = arith.divf %9, %10 : vector<2x4x1xf32>
    %cst_5 = arith.constant 9.99999997E-7 : f32
    %12 = vector.broadcast %cst_5 : f32 to vector<2x4x1xf32>
    %13 = arith.addf %11, %12 : vector<2x4x1xf32>
    %14 = math.rsqrt %13 : vector<2x4x1xf32>
    %c0_6 = arith.constant 0 : index
    %c0_7 = arith.constant 0 : index
    %c0_8 = arith.constant 0 : index
    %15 = vector.load %arg3[%c0_6, %c0_7, %c0_8] : memref<2x4x1xf32, #tpu.memory_space<vmem>>, vector<2x4x1xf32>
    %16 = arith.mulf %14, %15 : vector<2x4x1xf32>
    %c0_9 = arith.constant 0 : index
    %c0_10 = arith.constant 0 : index
    %c0_11 = arith.constant 0 : index
    %17 = vector.load %arg4[%c0_9, %c0_10, %c0_11] : memref<2x4x1xf32, #tpu.memory_space<vmem>>, vector<2x4x1xf32>
    %18 = arith.mulf %4, %16 : vector<2x4x1xf32>
    %19 = arith.subf %17, %18 : vector<2x4x1xf32>
    %20 = vector.extract_strided_slice %16 {offsets = [0, 0, 0], sizes = [1, 4, 1], strides = [1, 1, 1]} : vector<2x4x1xf32> to vector<1x4x1xf32>
    %21 = vector.shape_cast %20 : vector<1x4x1xf32> to vector<4x1xf32>
    %22 = vector.shape_cast %21 : vector<4x1xf32> to vector<4x1x1xf32>
    %23 = vector.shape_cast %22 : vector<4x1x1xf32> to vector<4x1x1xf32>
    %24 = vector.broadcast %23 : vector<4x1x1xf32> to vector<4x16x1xf32>
    %25 = vector.shape_cast %24 : vector<4x16x1xf32> to vector<64x1xf32>
    %26 = vector.shape_cast %25 : vector<64x1xf32> to vector<64x1xf32>
    %27 = vector.broadcast %26 : vector<64x1xf32> to vector<64x64xf32>
    %28 = vector.extract_strided_slice %16 {offsets = [1, 0, 0], sizes = [1, 4, 1], strides = [1, 1, 1]} : vector<2x4x1xf32> to vector<1x4x1xf32>
    %29 = vector.shape_cast %28 : vector<1x4x1xf32> to vector<4x1xf32>
    %30 = vector.shape_cast %29 : vector<4x1xf32> to vector<4x1x1xf32>
    %31 = vector.shape_cast %30 : vector<4x1x1xf32> to vector<4x1x1xf32>
    %32 = vector.broadcast %31 : vector<4x1x1xf32> to vector<4x16x1xf32>
    %33 = vector.shape_cast %32 : vector<4x16x1xf32> to vector<64x1xf32>
    %34 = vector.shape_cast %33 : vector<64x1xf32> to vector<64x1xf32>
    %35 = vector.broadcast %34 : vector<64x1xf32> to vector<64x64xf32>
    %36 = tpu.concatenate %27, %35 in 1 : vector<64x64xf32>, vector<64x64xf32> -> vector<64x128xf32>
    %37 = vector.extract_strided_slice %19 {offsets = [0, 0, 0], sizes = [1, 4, 1], strides = [1, 1, 1]} : vector<2x4x1xf32> to vector<1x4x1xf32>
    %38 = vector.shape_cast %37 : vector<1x4x1xf32> to vector<4x1xf32>
    %39 = vector.shape_cast %38 : vector<4x1xf32> to vector<4x1x1xf32>
    %40 = vector.shape_cast %39 : vector<4x1x1xf32> to vector<4x1x1xf32>
    %41 = vector.broadcast %40 : vector<4x1x1xf32> to vector<4x16x1xf32>
    %42 = vector.shape_cast %41 : vector<4x16x1xf32> to vector<64x1xf32>
    %43 = vector.shape_cast %42 : vector<64x1xf32> to vector<64x1xf32>
    %44 = vector.broadcast %43 : vector<64x1xf32> to vector<64x64xf32>
    %45 = vector.extract_strided_slice %19 {offsets = [1, 0, 0], sizes = [1, 4, 1], strides = [1, 1, 1]} : vector<2x4x1xf32> to vector<1x4x1xf32>
    %46 = vector.shape_cast %45 : vector<1x4x1xf32> to vector<4x1xf32>
    %47 = vector.shape_cast %46 : vector<4x1xf32> to vector<4x1x1xf32>
    %48 = vector.shape_cast %47 : vector<4x1x1xf32> to vector<4x1x1xf32>
    %49 = vector.broadcast %48 : vector<4x1x1xf32> to vector<4x16x1xf32>
    %50 = vector.shape_cast %49 : vector<4x16x1xf32> to vector<64x1xf32>
    %51 = vector.shape_cast %50 : vector<64x1xf32> to vector<64x1xf32>
    %52 = vector.broadcast %51 : vector<64x1xf32> to vector<64x64xf32>
    %53 = tpu.concatenate %44, %52 in 1 : vector<64x64xf32>, vector<64x64xf32> -> vector<64x128xf32>
    %c0_12 = arith.constant 0 : index
    %c0_13 = arith.constant 0 : index
    %54 = vector.load %arg2[%c0_12, %c0_13] : memref<64x128xf32, #tpu.memory_space<vmem>>, vector<64x128xf32>
    %55 = arith.mulf %54, %36 : vector<64x128xf32>
    %56 = arith.addf %55, %53 : vector<64x128xf32>
    %cst_14 = arith.constant 0.000000e+00 : f32
    %57 = vector.broadcast %cst_14 : f32 to vector<64x128xf32>
    %58 = arith.maximumf %56, %57 : vector<64x128xf32>
    %c0_15 = arith.constant 0 : index
    %c0_16 = arith.constant 0 : index
    %59 = vector.load %arg5[%c0_15, %c0_16] : memref<8x64xf32, #tpu.memory_space<vmem>>, vector<8x64xf32>
    %cst_17 = arith.constant dense<0.000000e+00> : vector<8x128xf32>
    %60 = tpu.matmul %59, %58, %cst_17 {dimension_numbers = #tpu.dot_dimension_numbers<[1], [0], [0], [1], [0, 0, 1, 1], [], []>} : vector<8x64xf32>, vector<64x128xf32>, vector<8x128xf32> -> vector<8x128xf32>
    %c0_18 = arith.constant 0 : index
    %c0_19 = arith.constant 0 : index
    %61 = vector.load %arg6[%c0_18, %c0_19] : memref<8x1xf32, #tpu.memory_space<vmem>>, vector<8x1xf32>
    %62 = vector.broadcast %61 : vector<8x1xf32> to vector<8x128xf32>
    %63 = arith.addf %60, %62 : vector<8x128xf32>
    %64 = vector.shape_cast %54 : vector<64x128xf32> to vector<4x16x128xf32>
    %cst_20 = arith.constant dense<0xFF800000> : vector<4x128xf32>
    %65 = vector.multi_reduction <maximumf>, %64, %cst_20 [1] : vector<4x16x128xf32> to vector<4x128xf32>
    %c0_21 = arith.constant 0 : index
    %c0_22 = arith.constant 0 : index
    %66 = vector.load %arg7[%c0_21, %c0_22] : memref<8x4xf32, #tpu.memory_space<vmem>>, vector<8x4xf32>
    %cst_23 = arith.constant dense<0.000000e+00> : vector<8x128xf32>
    %67 = tpu.matmul %66, %65, %cst_23 {dimension_numbers = #tpu.dot_dimension_numbers<[1], [0], [0], [1], [0, 0, 1, 1], [], []>} : vector<8x4xf32>, vector<4x128xf32>, vector<8x128xf32> -> vector<8x128xf32>
    %c0_24 = arith.constant 0 : index
    %c0_25 = arith.constant 0 : index
    %68 = vector.load %arg8[%c0_24, %c0_25] : memref<8x1xf32, #tpu.memory_space<vmem>>, vector<8x1xf32>
    %69 = vector.broadcast %68 : vector<8x1xf32> to vector<8x128xf32>
    %70 = arith.addf %67, %69 : vector<8x128xf32>
    %c0_26 = arith.constant 0 : index
    %71 = memref.load %arg9[%c0_26] : memref<1xf32, #tpu.memory_space<smem>>
    %72 = vector.broadcast %71 : f32 to vector<8x128xf32>
    %73 = arith.mulf %63, %72 : vector<8x128xf32>
    %74 = arith.addf %73, %70 : vector<8x128xf32>
    %c0_27 = arith.constant 0 : index
    %c0_28 = arith.constant 0 : index
    %75 = vector.load %arg10[%c0_27, %c0_28] : memref<8x128xf32, #tpu.memory_space<vmem>>, vector<8x128xf32>
    tpu.vector_store %arg10[%c0_27, %c0_28], %74 {strides = array<i32>} : memref<8x128xf32, #tpu.memory_space<vmem>>, vector<8x128xf32>,
    return
  }
  func.func @transform_0(%arg0: i32) -> (i32, i32, i32) {
    %c0_i32 = arith.constant 0 : i32
    %c0_i32_0 = arith.constant 0 : i32
    %c0_i32_1 = arith.constant 0 : i32
    return %arg0, %c0_i32, %c0_i32_0 : i32, i32, i32
  }
  func.func @transform_1(%arg0: i32) -> (i32, i32) {
    %c0_i32 = arith.constant 0 : i32
    %c0_i32_0 = arith.constant 0 : i32
    return %c0_i32, %arg0 : i32, i32
  }
  func.func @transform_2(%arg0: i32) -> (i32, i32, i32) {
    %c0_i32 = arith.constant 0 : i32
    %c0_i32_0 = arith.constant 0 : i32
    %c0_i32_1 = arith.constant 0 : i32
    return %arg0, %c0_i32, %c0_i32_0 : i32, i32, i32
  }
  func.func @transform_3(%arg0: i32) -> (i32, i32, i32) {
    %c0_i32 = arith.constant 0 : i32
    %c0_i32_0 = arith.constant 0 : i32
    %c0_i32_1 = arith.constant 0 : i32
    return %arg0, %c0_i32, %c0_i32_0 : i32, i32, i32
  }
  func.func @transform_4(%arg0: i32) -> (i32, i32) {
    %c0_i32 = arith.constant 0 : i32
    %c0_i32_0 = arith.constant 0 : i32
    %c0_i32_1 = arith.constant 0 : i32
    return %c0_i32, %c0_i32_0 : i32, i32
  }
  func.func @transform_5(%arg0: i32) -> (i32, i32) {
    %c0_i32 = arith.constant 0 : i32
    %c0_i32_0 = arith.constant 0 : i32
    %c0_i32_1 = arith.constant 0 : i32
    return %c0_i32, %c0_i32_0 : i32, i32
  }
  func.func @transform_6(%arg0: i32) -> (i32, i32) {
    %c0_i32 = arith.constant 0 : i32
    %c0_i32_0 = arith.constant 0 : i32
    %c0_i32_1 = arith.constant 0 : i32
    return %c0_i32, %c0_i32_0 : i32, i32
  }
  func.func @transform_7(%arg0: i32) -> (i32, i32) {
    %c0_i32 = arith.constant 0 : i32
    %c0_i32_0 = arith.constant 0 : i32
    %c0_i32_1 = arith.constant 0 : i32
    return %c0_i32, %c0_i32_0 : i32, i32
  }
  func.func @transform_8(%arg0: i32) -> i32 {
    %c0_i32 = arith.constant 0 : i32
    %c0_i32_0 = arith.constant 0 : i32
    return %c0_i32 : i32
  }
  func.func @transform_9(%arg0: i32) -> (i32, i32) {
    %c0_i32 = arith.constant 0 : i32
    %c0_i32_0 = arith.constant 0 : i32
    return %c0_i32, %arg0 : i32, i32
  }
}

</mosaic_0001>

<bundles_post_ra>
// kernel: tpu_custom_call.1
= control target key start
LH: loop header
LB: loop body
LE: loop exit
PB: predicated region body
PF: predicated region fallthrough
CT: control target
= control target key end

     0   :  { %15 = vsyncpa [#allocation4], 0  ;;  %s935_s0 = inlined_call_operand.vmem [shape: f32[2,4,256], index: 0, kind: input, shape index: {}]   ;;  %s936_s1 = inlined_call_operand.hbm [shape: f32[64,128], index: 1, kind: input, shape index: {}]   ;;  %s937_s2 = inlined_call_operand.vmem [shape: f32[2,4,1], index: 2, kind: input, shape index: {}]   ;;  %s938_s3 = inlined_call_operand.vmem [shape: f32[2,4,1], index: 3, kind: input, shape index: {}]   ;;  %s939_s4 = inlined_call_operand.vmem [shape: f32[8,64], index: 4, kind: input, shape index: {}]   ;;  %s940_s5 = inlined_call_operand.vmem [shape: f32[8,1], index: 5, kind: input, shape index: {}]   ;;  %s941_s6 = inlined_call_operand.vmem [shape: f32[8,4], index: 6, kind: input, shape index: {}]   ;;  %s942_s7 = inlined_call_operand.vmem [shape: f32[8,1], index: 7, kind: input, shape index: {}]   ;;  %s943_s8 = inlined_call_operand.<no memory space> [shape: f32[1], index: 8, kind: input, shape index: {}]   ;;  %s944_s9 = inlined_call_operand.hbm [shape: f32[8,128], index: 9, kind: output, shape index: {}]  }
   0x1   :  { %16 = vsyncpa [#allocation5], 0  ;;  %s731_s30 = smov [#allocation3]   ;;  %s683_s13 = scalar_lea.hbm %s936_s1, 1024 }
   0x2   :  { %s24_s10 = sshll.u32 %s731_s30, 4  ;;  %p684_p0 = scmp.ne.s32.totalorder %s936_s1, %s683_s13  ;;  %s25_s10 = int_to_ptr.vmem [resolvable:$true] %s24_s10 }
   0x3   :  { %p687_p1 = scmp.lt.u32.totalorder %s683_s13, %s936_s1 }
   0x5   :  { %p689_p2 = pnand %p687_p1, %p684_p0 }
   0x7   :  { %692 = shalt.err (!%p689_p2)
}
   0x8   :  { %s693_s18 = scalar_lea.vmem %s25_s10, 1024  ;;  %p698_p4 = scmp.lt.s32.totalorder %s25_s10, %s25_s10 }
   0x9   :  { %p694_p3 = scmp.ne.s32.totalorder %s25_s10, %s693_s18  ;;  %p699_p5 = scmp.lt.s32.totalorder %s693_s18, %s693_s18 }
   0xb   :  { %p700_p6 = por %p699_p5, %p698_p4 }
   0xd   :  { %p701_p7 = pnand %p700_p6, %p694_p3 }
   0xf   :  { %704 = shalt.err (!%p701_p7)
}
  0x10   :  { %s732_s19 = smov 128   ;;  %s733_s20 = smov 8  }
  0x11   :  { %30 = dma.hbm_to_vmem [thread:$0]  %s936_s1, 1024, %s25_s10, [#allocation4], %s732_s19, %s732_s19, %s733_s20  }
  0x12   :  { %727 = dma.done.wait [#allocation4], 1024  }
  0x13   :  { %728 = vsyncadd [#allocation4], 4294966272  ;;  %vm56_vm0 = vcmask 1043456   ;;  %v806_v0 = vld [vmem:[%s935_s0] sm:$0xff]  ;;  %v811_v1 = vld [vmem:[%s935_s0 + $0x8] sm:$0xff]  ;;  %v734_v13 = vmov 0.0   ;;  %v75_v53 = vlaneseq }
  0x14   :  { %v52_v2 = vcombine.high %v806_v0, %v806_v0  ;;  %v57_v3 = vsel %vm56_vm0, %v806_v0, 0.0  ;;  %v53_v4 = vcombine.high %v811_v1, %v811_v1  ;;  %v62_v6 = vsel %vm56_vm0, %v811_v1, 0.0  ;;  %v823_v10 = vld [vmem:[#allocation3] sm:$0xff]  ;;  %v825_v11 = vld [vmem:[#allocation3 + $0x8] sm:$0xff]  ;;  %v827_v12 = vld [vmem:[#allocation3 + $0x10] sm:$0xff]  ;;  %648 = vmatprep.subr.mxu1 %v734_v13  ;;  %s740_s17 = smov [#allocation6]  }
  0x15   :  { %v829_v14 = vld [vmem:[#allocation3 + $0x18] sm:$0xff]  ;;  %v831_v15 = vld [vmem:[#allocation3 + $0x20] sm:$0xff]  ;;  %v833_v16 = vld [vmem:[#allocation3 + $0x28] sm:$0xff]  ;;  %v474_v17 = vmax.f32 %v823_v10, %v825_v11  ;;  %vm735_vm1 = vmmov 0   ;;  %vm513_vm2 = vcmask 1041409   ;;  %vm515_vm3 = vcmask 1042434  }
  0x16   :  { %v58_v5 = vsel %vm56_vm0, %v52_v2, 0.0  ;;  %v63_v7 = vsel %vm56_vm0, %v53_v4, 0.0  ;;  %v837_v18 = vld [vmem:[#allocation3 + $0x30] sm:$0xff]  ;;  %v839_v19 = vld [vmem:[#allocation3 + $0x38] sm:$0xff]  ;;  %v481_v20 = vmax.f32 %v827_v12, %v829_v14  ;;  %v488_v21 = vmax.f32 %v831_v15, %v833_v16  ;;  %650 = vmatprep.mubr.msk.f32.mxu1 %vm735_vm1, %v734_v13  ;;  %645 = vmatprep.mubr.msk.f32.mxu0 %vm735_vm1, %v734_v13  ;;  %v502_v49 = vld [vmem:[%s941_s6] sm:$0xff]  ;;  %s606_s18 = sshll.u32 %s740_s17, 4  ;;  %s607_s18 = int_to_ptr.vmem [resolvable:$true] %s606_s18 }
  0x17   :  { %v59_v8 = vadd.f32 %v58_v5, %v57_v3  ;;  %v64_v9 = vadd.f32 %v63_v7, %v62_v6  ;;  %v475_v22 = vrot.slane %v474_v17, 4  ;;  %v495_v23 = vmax.f32 %v837_v18, %v839_v19  ;;  %p710_p9 = scmp.lt.s32.totalorder %s607_s18, %s607_s18 }
  0x18   :  { %v482_v24 = vrot.slane %v481_v20, 4  ;;  %v489_v25 = vrot.slane %v488_v21, 4  ;;  %vm517_vm4 = vcmask 1043459   ;;  %vm519_vm5 = vcmask 31744  }
  0x19   :  { %60 = vadd.xlane.f32.xlu0 %v59_v8  ;;  %v476_v26 = vmax.f32 %v474_v17, %v475_v22  ;;  %v496_v27 = vrot.slane %v495_v23, 4  ;;  %v736_v51 = vmov 839922192   ;;  %v76_v55 = vshrl.u32 %v75_v53, 7  ;;  %v119_v53 = vld [vmem:[%s938_s3] sm:$0xf] }
  0x1a   :  { %v483_v28 = vmax.f32 %v481_v20, %v482_v24  ;;  %v490_v29 = vmax.f32 %v488_v21, %v489_v25  ;;  %v73_v52 = vunpack.c.l.s4 %v736_v51  ;;  %v738_v25 = vmov 1966171168  }
  0x1b   :  { %v477_v30 = vrot.slane %v476_v26, 2  ;;  %v497_v31 = vmax.f32 %v495_v23, %v496_v27  ;;  %vm239_vm6 = vcmask 523264  }
  0x1c   :  { %v484_v32 = vrot.slane %v483_v28, 2  ;;  %v491_v33 = vrot.slane %v490_v29, 2  ;;  %v74_v54 = vunpack.c.0.s8 %v73_v52 }
  0x1d   :  { %65 = vadd.xlane.f32.xlu0 %v64_v9  ;;  %v478_v34 = vmax.f32 %v476_v26, %v477_v30  ;;  %v498_v35 = vrot.slane %v497_v31, 2  ;;  %v127_v26 = vunpack.c.l.s4 %v738_v25  ;;  %v739_v25 = vmov 0.0|0.0  }
  0x1e   :  { %v485_v36 = vmax.f32 %v483_v28, %v484_v32  ;;  %v492_v37 = vmax.f32 %v490_v29, %v491_v33  ;;  %v77_v56 = vsub.s32 %v74_v54, %v76_v55  ;;  %v115_v29 = vld [vmem:[%s937_s2] sm:$0xf]  ;;  %v116_v33 = vld [vmem:[%s937_s2 + $0x4] sm:$0xf]  ;;  %653 = vmatprep.subr.bf16.mxu0 %v739_v25 }
  0x1f   :  { %v479_v38 = vrot.slane %v478_v34, 1  ;;  %v499_v39 = vmax.f32 %v497_v31, %v498_v35  ;;  %v128_v28 = vunpack.c.0.s8 %v127_v26 }
  0x20   :  { %v486_v40 = vrot.slane %v485_v36, 1  ;;  %v493_v41 = vrot.slane %v492_v37, 1 }
  0x21   :  { %v480_v42 = vmax.f32 %v478_v34, %v479_v38  ;;  %v500_v43 = vrot.slane %v499_v39, 1  ;;  %v131_v30 = vsub.s32 %v128_v28, %v76_v55  ;;  %v863_v34 = vsub.s32 0, %v76_v55 }
  0x22   :  { %v487_v44 = vmax.f32 %v485_v36, %v486_v40  ;;  %v494_v45 = vmax.f32 %v492_v37, %v493_v41  ;;  %v120_v40 = vld [vmem:[%s938_s3 + $0x4] sm:$0xf] }
  0x23   :  { %v501_v46 = vmax.f32 %v499_v39, %v500_v43 }
  0x24   :  { %v514_v47 = vsel %vm513_vm2, %v487_v44, %v480_v42 }
  0x25   :  { %v516_v48 = vsel %vm515_vm3, %v494_v45, %v514_v47 }
  0x26   :  { %v518_v50 = vsel %vm517_vm4, %v501_v46, %v516_v48 }
  0x27   :  { %649 = vmatpush3.msk.msra.mxu1 %vm56_vm0, %v518_v50 }
  0x28   :  { %651 = vmatmul.mubr.msk.f32.vlgmr.msra.gmra.mrb[0].mxu1 %vm519_vm5, %v502_v49 }
  0xa6   :  { %v61_v57 = vpop.xlane.xlu0 %60 }
  0xa7   :  { %v68_v58 = vmul.f32 0.00390625, %v61_v57 }
  0xa9   :  { %v78_v59 = vrot.slane %v68_v58, %v77_v56 }
  0xaa   :  { %v66_v60 = vpop.xlane.xlu0 %65 }
  0xab   :  { %v69_v61 = vmul.f32 0.00390625, %v66_v60  ;;  %v88_v62 = vsub.f32 %v806_v0, %v78_v59  ;;  %v737_v0 = vmov 0  }
  0xac   :  { %675 = vset.pattern.permute.xlu0 %v737_v0  ;;  %676 = vset.pattern.permute.xlu1 %v737_v0 }
  0xad   :  { %v85_v63 = vrot.slane %v69_v61, %v77_v56  ;;  %v90_v2 = vmul.f32 %v88_v62, %v88_v62 }
  0xaf   :  { %v89_v3 = vsub.f32 %v811_v1, %v85_v63  ;;  %v94_v4 = vcombine.high %v90_v2, %v90_v2  ;;  %v98_v5 = vsel %vm56_vm0, %v90_v2, 0.0 }
  0xb1   :  { %v99_v6 = vsel %vm56_vm0, %v94_v4, 0.0  ;;  %v91_v7 = vmul.f32 %v89_v3, %v89_v3 }
  0xb2   :  { %v100_v8 = vadd.f32 %v99_v6, %v98_v5 }
  0xb3   :  { %v95_v9 = vcombine.high %v91_v7, %v91_v7  ;;  %v103_v13 = vsel %vm56_vm0, %v91_v7, 0.0 }
  0xb4   :  { %101 = vadd.xlane.f32.xlu1 %v100_v8 }
  0xb5   :  { %v104_v17 = vsel %vm56_vm0, %v95_v9, 0.0 }
  0xb6   :  { %v105_v20 = vadd.f32 %v104_v17, %v103_v13  ;;  %v503_v13 = vld [vmem:[%s942_s7] sm:$0xff] }
  0xb8   :  { %106 = vadd.xlane.f32.xlu1 %v105_v20 }
 0x141   :  { %v102_v21 = vpop.xlane.xlu1 %101 }
 0x142   :  { %v109_v1 = vmul.f32 0.003921569, %v102_v21 }
 0x144   :  { %v111_v22 = vadd.f32 1e-06, %v109_v1 }
 0x145   :  { %v107_v23 = vpop.xlane.xlu1 %106 }
 0x146   :  { %679 = vrsqrt.f32 %v111_v22  ;;  %v110_v24 = vmul.f32 0.003921569, %v107_v23  ;;  %v886_v22 = vpop.f32.mrb[0].mxu1 }
 0x147   :  { %v652_v23 = vpop.f32.mrb[1].mxu1 }
 0x148   :  { %v112_v27 = vadd.f32 1e-06, %v110_v24 }
 0x14a   :  { %681 = vrsqrt.f32 %v112_v27 }
 0x150   :  { %v680_v31 = vpop.eup %679 }
 0x151   :  { %v117_v32 = vmul.f32 %v680_v31, %v115_v29  ;;  %v395_v31 = vld [vmem:[%s940_s5] sm:$0xff] }
 0x153   :  { %v132_v35 = vrot.slane %v117_v32, %v131_v30  ;;  %v121_v48 = vmul.f32 %v117_v32, %v68_v58 }
 0x154   :  { %v682_v36 = vpop.eup %681 }
 0x155   :  { %v140_v37 = vrot.slane %v132_v35, %v131_v30  ;;  %v118_v38 = vmul.f32 %v682_v36, %v116_v33  ;;  %v133_v39 = vcombine.high %v132_v35, %v132_v35  ;;  %v123_v60 = vsub.f32 %v119_v53, %v121_v48 }
 0x157   :  { %v153_v41 = vrot.slane %v140_v37, %v863_v34  ;;  %v189_v42 = vrot.slane %v118_v38, %v131_v30  ;;  %v122_v43 = vmul.f32 %v118_v38, %v69_v61  ;;  %v147_v47 = vrot.slane %v133_v39, %v131_v30 }
 0x158   :  { %v148_v2 = vcombine.high %v140_v37, %v140_v37  ;;  %v251_v3 = vrot.slane %v123_v60, %v131_v30 }
 0x159   :  { %167 = vperm.xlu0 %675, %v153_v41   ;;  %v197_v44 = vrot.slane %v189_v42, %v131_v30  ;;  %v190_v45 = vcombine.high %v189_v42, %v189_v42  ;;  %v124_v46 = vsub.f32 %v120_v40, %v122_v43  ;;  %v157_v59 = vrot.slane %v147_v47, %v863_v34 }
 0x15a   :  { %v161_v6 = vrot.slane %v148_v2, %v863_v34  ;;  %v259_v7 = vrot.slane %v251_v3, %v131_v30  ;;  %v149_v20 = vcombine.high %v147_v47, %v147_v47  ;;  %v252_v0 = vcombine.high %v251_v3, %v251_v3 }
 0x15b   :  { %v210_v49 = vrot.slane %v197_v44, %v863_v34  ;;  %v205_v50 = vcombine.high %v197_v44, %v197_v44  ;;  %v204_v51 = vrot.slane %v190_v45, %v131_v30  ;;  %v308_v52 = vrot.slane %v124_v46, %v131_v30 }
 0x15c   :  { %v272_v9 = vrot.slane %v259_v7, %v863_v34  ;;  %v165_v21 = vrot.slane %v149_v20, %v863_v34  ;;  %v266_v1 = vrot.slane %v252_v0, %v131_v30  ;;  %v267_v27 = vcombine.high %v259_v7, %v259_v7 }
 0x15d   :  { %224 = vperm.xlu1 %676, %v210_v49   ;;  %v218_v54 = vrot.slane %v205_v50, %v863_v34  ;;  %v206_v55 = vcombine.high %v204_v51, %v204_v51  ;;  %v316_v56 = vrot.slane %v308_v52, %v131_v30  ;;  %v309_v57 = vcombine.high %v308_v52, %v308_v52 }
 0x15e   :  { %v214_v63 = vrot.slane %v204_v51, %v863_v34  ;;  %v276_v24 = vrot.slane %v266_v1, %v863_v34  ;;  %v280_v28 = vrot.slane %v267_v27, %v863_v34  ;;  %v268_v29 = vcombine.high %v266_v1, %v266_v1 }
 0x15f   :  { %232 = vperm.xlu0 %675, %v218_v54   ;;  %v222_v58 = vrot.slane %v206_v55, %v863_v34  ;;  %v324_v61 = vcombine.high %v316_v56, %v316_v56  ;;  %v323_v62 = vrot.slane %v309_v57, %v131_v30  ;;  %v329_v17 = vrot.slane %v316_v56, %v863_v34 }
 0x160   :  { %v284_v30 = vrot.slane %v268_v29, %v863_v34 }
 0x161   :  { %171 = vperm.xlu1 %676, %v157_v59   ;;  %v337_v4 = vrot.slane %v324_v61, %v863_v34  ;;  %v325_v5 = vcombine.high %v323_v62, %v323_v62  ;;  %v333_v26 = vrot.slane %v323_v62, %v863_v34 }
 0x163   :  { %236 = vperm.xlu0 %675, %v222_v58   ;;  %v341_v8 = vrot.slane %v325_v5, %v863_v34 }
 0x165   :  { %228 = vperm.xlu1 %676, %v214_v63  }
 0x167   :  { %351 = vperm.xlu0 %675, %v337_v4  }
 0x169   :  { %175 = vperm.xlu1 %676, %v161_v6  }
 0x16b   :  { %355 = vperm.xlu0 %675, %v341_v8  }
 0x16d   :  { %286 = vperm.xlu1 %676, %v272_v9  }
 0x16f   :  { %506 = vperm.xlu0 %675, %v503_v13  }
 0x171   :  { %343 = vperm.xlu1 %676, %v329_v17  }
 0x175   :  { %179 = vperm.xlu1 %676, %v165_v21  }
 0x179   :  { %290 = vperm.xlu1 %676, %v276_v24  }
 0x17d   :  { %347 = vperm.xlu1 %676, %v333_v26   ;;  %v596_v26 = vstv %s943_s8 }
 0x181   :  { %294 = vperm.xlu1 %676, %v280_v28  }
 0x185   :  { %298 = vperm.xlu1 %676, %v284_v30  }
 0x189   :  { %398 = vperm.xlu1 %676, %v395_v31  }
 0x1d8   :  { %v168_v37 = vpop.permute.xlu0 %167 }
 0x1dc   :  { %v225_v32 = vpop.permute.xlu1 %224 }
 0x1dd   :  { %v240_v39 = vsel %vm239_vm6, %v168_v37, %v225_v32 }
 0x1de   :  { %v370_v40 = vmul.f32 %v823_v10, %v240_v39  ;;  %v371_v41 = vmul.f32 %v825_v11, %v240_v39  ;;  %v233_v43 = vpop.permute.xlu0 %232 }
 0x1e0   :  { %v172_v33 = vpop.permute.xlu1 %171 }
 0x1e2   :  { %v237_v50 = vpop.permute.xlu0 %236 }
 0x1e4   :  { %v229_v35 = vpop.permute.xlu1 %228 }
 0x1e5   :  { %v241_v52 = vsel %vm239_vm6, %v172_v33, %v229_v35 }
 0x1e6   :  { %v372_v10 = vmul.f32 %v827_v12, %v241_v52  ;;  %v373_v11 = vmul.f32 %v829_v14, %v241_v52  ;;  %v352_v56 = vpop.permute.xlu0 %351 }
 0x1e8   :  { %v176_v36 = vpop.permute.xlu1 %175 }
 0x1e9   :  { %v242_v54 = vsel %vm239_vm6, %v176_v36, %v233_v43 }
 0x1ea   :  { %v374_v60 = vmul.f32 %v831_v15, %v242_v54  ;;  %v375_v58 = vmul.f32 %v833_v16, %v242_v54  ;;  %v356_v5 = vpop.permute.xlu0 %355 }
 0x1ec   :  { %v287_v38 = vpop.permute.xlu1 %286 }
 0x1f0   :  { %v344_v34 = vpop.permute.xlu1 %343 }
 0x1f1   :  { %v358_v42 = vsel %vm239_vm6, %v287_v38, %v344_v34 }
 0x1f2   :  { %v378_v44 = vadd.f32 %v370_v40, %v358_v42  ;;  %v379_v45 = vadd.f32 %v371_v41, %v358_v42 }
 0x1f4   :  { %v386_v46 = vmax.f32 %v378_v44, 0.0  ;;  %v387_v47 = vmax.f32 %v379_v45, 0.0  ;;  %v180_v48 = vpop.permute.xlu1 %179 }
 0x1f5   :  { %v243_v2 = vsel %vm239_vm6, %v180_v48, %v237_v50 }
 0x1f6   :  { %v654_v49 = vpack.c.bf16 %v387_v47, %v386_v46  ;;  %v376_v6 = vmul.f32 %v837_v18, %v243_v2  ;;  %v377_v7 = vmul.f32 %v839_v19, %v243_v2  ;;  %v394_v18 = vld [vmem:[%s939_s4] sm:$0xff]  ;;  %v507_v19 = vpop.permute.xlu0 %506  ;;  %s705_s4 = scalar_lea.vmem %s607_s18, 128 }
 0x1f7   :  { %p706_p8 = scmp.ne.s32.totalorder %s607_s18, %s705_s4  ;;  %p711_p10 = scmp.lt.s32.totalorder %s705_s4, %s705_s4 }
 0x1f8   :  { %v291_v51 = vpop.permute.xlu1 %290  ;;  %655 = vmatpush3.bf16.msra.mxu0 %v654_v49 }
 0x1f9   :  { %656 = vmatprep.subr.bf16.mxu0 %v739_v25  ;;  %p712_p11 = por %p711_p10, %p710_p9 }
 0x1fb   :  { %p713_p12 = pnand %p712_p11, %p706_p8 }
 0x1fc   :  { %v348_v53 = vpop.permute.xlu1 %347 }
 0x1fd   :  { %v359_v55 = vsel %vm239_vm6, %v291_v51, %v348_v53 }
 0x1fe   :  { %v380_v57 = vadd.f32 %v372_v10, %v359_v55  ;;  %v381_v59 = vadd.f32 %v373_v11, %v359_v55 }
 0x200   :  { %v388_v61 = vmax.f32 %v380_v57, 0.0  ;;  %v389_v62 = vmax.f32 %v381_v59, 0.0  ;;  %v295_v63 = vpop.permute.xlu1 %294 }
 0x201   :  { %v360_v12 = vsel %vm239_vm6, %v295_v63, %v352_v56 }
 0x202   :  { %v382_v14 = vadd.f32 %v374_v60, %v360_v12  ;;  %v383_v3 = vadd.f32 %v375_v58, %v360_v12  ;;  %v657_v4 = vpack.c.bf16 %v389_v62, %v388_v61 }
 0x204   :  { %v390_v8 = vmax.f32 %v382_v14, 0.0  ;;  %v391_v9 = vmax.f32 %v383_v3, 0.0  ;;  %v299_v15 = vpop.permute.xlu1 %298  ;;  %658 = vmatpush3.bf16.msra.mxu0 %v657_v4 }
 0x205   :  { %v361_v16 = vsel %vm239_vm6, %v299_v15, %v356_v5  ;;  %659 = vmatprep.subr.bf16.mxu0 %v739_v25 }
 0x206   :  { %v384_v13 = vadd.f32 %v376_v6, %v361_v16  ;;  %v385_v17 = vadd.f32 %v377_v7, %v361_v16  ;;  %v660_v20 = vpack.c.bf16 %v391_v9, %v390_v8 }
 0x208   :  { %v392_v0 = vmax.f32 %v384_v13, 0.0  ;;  %v393_v21 = vmax.f32 %v385_v17, 0.0  ;;  %661 = vmatpush3.bf16.msra.mxu0 %v660_v20  ;;  %v399_v23 = vpop.permute.xlu1 %398 }
 0x209   :  { %662 = vmatprep.subr.bf16.mxu0 %v739_v25  ;;  %v592_v25 = vadd.f32 %v886_v22, %v507_v19 }
 0x20a   :  { %v663_v1 = vpack.c.bf16 %v393_v21, %v392_v0 }
 0x20c   :  { %664 = vmatpush3.bf16.msra.mxu0 %v663_v1 }
 0x20f   :  { %646 = vmatmul.mubr.msk.f32.vlgmr.msra.gmra.mrb[0].mxu0 %vm239_vm6, %v394_v18 }
 0x2e2   :  { %v470_v24 = vpop.f32.mrb[0].mxu0 }
 0x2e3   :  { %v471_v27 = vadd.f32 %v470_v24, %v399_v23  ;;  %v647_v28 = vpop.f32.mrb[1].mxu0 }
 0x2e5   :  { %v597_v29 = vmul.f32 %v596_v26, %v471_v27 }
 0x2e7   :  { %v598_v30 = vadd.f32 %v597_v29, %v592_v25 }
 0x2e9   :  { %599 = vst [vmem:[#allocation6] sm:$0xff] %v598_v30 }
 0x2ea   :  { %716 = shalt.err (!%p713_p12)
}
 0x2eb   :  { %s717_s8 = scalar_lea.hbm %s944_s9, 128 }
 0x2ec   :  { %p718_p13 = scmp.ne.s32.totalorder %s944_s9, %s717_s8  ;;  %p721_p0 = scmp.lt.u32.totalorder %s717_s8, %s944_s9 }
 0x2ee   :  { %p723_p1 = pnand %p721_p0, %p718_p13 }
 0x2f0   :  { %726 = shalt.err (!%p723_p1)
}
 0x2f1   :  { %609 = dma.vmem_to_hbm [thread:$0]  %s607_s18, 128, %s944_s9, [#allocation5]  }
 0x2f2   :  { %729 = dma.done.wait [#allocation5], 128  }
 0x2f3   :  { %730 = vsyncadd [#allocation5], 4294967168 }
 0x2f4   :  { %613 = vsyncpa [#allocation4], 1 }
 0x2f5   :  { %614 = vsyncpa [#allocation5], 1 }

</bundles_post_ra>
